<compile_context>
chip_gen: v7x
topology: tpu7x:2x2x1
jax: 0.10.0
libtpu: 0.0.40
codegen_flags: <defaults>
</compile_context>

<pallas_src>
import functools

import jax
import jax.numpy as jnp
from jax import lax
from jax.experimental import pallas as pl
from jax.experimental.pallas import tpu as pltpu

_LANE = 128
_NEG_INF = -1e30  # finite "minus infinity": exp() underflows to exactly 0


def _round_up(v, m):
    return ((v + m - 1) // m) * m


def _ce_kernel(x_ref, wt_ref, b_ref, t_ref, out_ref, m_sc, l_sc, p_sc,
               *, batch, block_b, block_c, mxu_dtype):
    i = pl.program_id(0)  # batch tile axis ("parallel")
    j = pl.program_id(1)  # class tile axis ("arbitrary", innermost)

    @pl.when(j == 0)
    def _():
        m_sc[...] = jnp.full(m_sc.shape, _NEG_INF, m_sc.dtype)
        l_sc[...] = jnp.zeros(l_sc.shape, l_sc.dtype)
        p_sc[...] = jnp.zeros(p_sc.shape, p_sc.dtype)

    # Logits for this (batch-tile, class-tile): (TB, TC) with f32 MXU accumulation.
    x = x_ref[...]
    w = wt_ref[...]
    if mxu_dtype != jnp.float32:
        x = x.astype(mxu_dtype)          # W^T was cast once in the wrapper
    y = jnp.dot(x, w, preferred_element_type=jnp.float32) + b_ref[...]

    tb, tc = y.shape
    # Gather-free pick of y[row, target[row]] via a one-hot lane mask.  Real
    # targets are < nclasses so padded (-1e30-bias) columns are never picked.
    cls = j * block_c + lax.broadcasted_iota(jnp.int32, (tb, tc), 1)
    p_sc[...] += jnp.sum(jnp.where(cls == t_ref[...], y, 0.0),
                         axis=-1, keepdims=True)

    # Online (flash-style) max-shifted logsumexp across class tiles.
    m_prev = m_sc[...]
    m_new = jnp.maximum(m_prev, jnp.max(y, axis=-1, keepdims=True))
    l_sc[...] = (l_sc[...] * jnp.exp(m_prev - m_new)
                 + jnp.sum(jnp.exp(y - m_new), axis=-1, keepdims=True))
    m_sc[...] = m_new

    @pl.when(j == pl.num_programs(1) - 1)
    def _():
        lse = m_sc[...] + jnp.log(l_sc[...])
        row = i * block_b + lax.broadcasted_iota(jnp.int32, (tb, 1), 0)
        # Rows past the real batch (ragged last tile) contribute exactly 0.
        out_ref[...] = jnp.where(row < batch, lse - p_sc[...], 0.0)


def softmax_ce_loss(x, weight, bias, targets, *, block_b=None, block_c=None,
                    mxu_dtype=jnp.float32):
    """x: (B, F) f32; weight: (C, F); bias: (C,); targets: (B,) int -> scalar f32 loss."""
    b, f = x.shape
    c = weight.shape[0]

    # ---- tile sizes --------------------------------------------------------
    # Batch tile: big enough to amortize the ~0.35us per-grid-step overhead.
    # TODO(synk): raise to 1024 on v7x (3.2 TB/s HBM) via pltpu.get_tpu_info().
    if block_b is None:
        block_b = 512 if b >= 512 else _round_up(b, 8)
    cp128 = _round_up(c, _LANE)
    if block_c is None:
        block_c = min(cp128, 1024)
    block_c = _round_up(block_c, _LANE)

    w_bytes = 2 if mxu_dtype == jnp.bfloat16 else 4

    def vmem_need(tb, tc):
        return (2 * tb * f * 4          # x tile (double-buffered, f32 stream)
                + 2 * f * tc * w_bytes  # W^T tile
                + 2 * tc * 4            # bias tile
                + 2 * tb * 4            # targets tile (int32)
                + 2 * tb * 4            # per-row loss output block
                + 3 * tb * 4)           # m / l / picked VMEM scratch

    # Auto-shrink so we stay comfortably under v7x's 64 MiB physical VMEM.
    budget = 48 * 1024 * 1024
    while vmem_need(block_b, block_c) > budget and block_c > _LANE:
        block_c = max(_LANE, _round_up(block_c // 2, _LANE))
    while vmem_need(block_b, block_c) > budget and block_b > 8:
        block_b = max(8, _round_up(block_b // 2, 8))

    num_b = pl.cdiv(b, block_b)
    cp = _round_up(c, block_c)
    num_c = cp // block_c

    # ---- tiny parameter-side padding only (x / targets are streamed as-is) --
    w_p = jnp.zeros((f, cp), mxu_dtype).at[:, :c].set(weight.T.astype(mxu_dtype))
    b_p = jnp.full((1, cp), _NEG_INF, jnp.float32).at[0, :c].set(
        bias.astype(jnp.float32))
    t_2d = targets.astype(jnp.int32).reshape(b, 1)

    vmem_limit = int(min(max(2 * vmem_need(block_b, block_c),
                             32 * 1024 * 1024),
                         64 * 1024 * 1024))

    partial_losses = pl.pallas_call(
        functools.partial(_ce_kernel, batch=b, block_b=block_b,
                          block_c=block_c, mxu_dtype=mxu_dtype),
        out_shape=jax.ShapeDtypeStruct((num_b * block_b, 1), jnp.float32),
        grid=(num_b, num_c),
        in_specs=[
            pl.BlockSpec((block_b, f), lambda i, j: (i, 0)),   # x: stays put over j
            pl.BlockSpec((f, block_c), lambda i, j: (0, j)),   # W^T class tile
            pl.BlockSpec((1, block_c), lambda i, j: (0, j)),   # bias class tile
            pl.BlockSpec((block_b, 1), lambda i, j: (i, 0)),   # targets
        ],
        out_specs=pl.BlockSpec((block_b, 1), lambda i, j: (i, 0)),  # per-row losses
        scratch_shapes=[
            pltpu.VMEM((block_b, 1), jnp.float32),   # running max
            pltpu.VMEM((block_b, 1), jnp.float32),   # running exp-sum
            pltpu.VMEM((block_b, 1), jnp.float32),   # running picked logit
        ],
        compiler_params=pltpu.CompilerParams(
            # batch axis independent across tiles -> "parallel" (v7x dual-TC);
            # class axis accumulates into scratch/output -> "arbitrary".
            dimension_semantics=("parallel", "arbitrary"),
            vmem_limit_bytes=vmem_limit,
        ),
    )(x, w_p, b_p, t_2d)

    # Tiny wrapper reduction; invalid (padded-tile) rows were written as 0.
    return jnp.sum(partial_losses) / b


if __name__ == "__main__":
    # Small shapes implied by the module: inputs (batch, nfeatures), targets (batch,)
    batch, nfeatures, nclasses = 8, 32, 16

    key = jax.random.PRNGKey(0)
    k_x, k_w, k_b, k_t = jax.random.split(key, 4)

    # Parameter init matching the PyTorch module's __init__:
    #   xavier_normal_ on fc.weight: std = sqrt(2 / (fan_in + fan_out))
    #   default Linear bias: U(-1/sqrt(fan_in), 1/sqrt(fan_in))
    w_std = (2.0 / (nfeatures + nclasses)) ** 0.5
    weight = jax.random.normal(k_w, (nclasses, nfeatures), jnp.float32) * w_std
    bound = 1.0 / (nfeatures ** 0.5)
    bias = jax.random.uniform(k_b, (nclasses,), minval=-bound, maxval=bound,
                              dtype=jnp.float32)

    x = jax.random.normal(k_x, (batch, nfeatures), jnp.float32)
    targets = jax.random.randint(k_t, (batch,), 0, nclasses, dtype=jnp.int32)

    loss = softmax_ce_loss(x, weight, bias, targets)
    jax.block_until_ready(loss)

    # Pure-JAX reference check (sanity; not part of the kernel).
    y_ref = x @ weight.T + bias
    lse_ref = jax.scipy.special.logsumexp(y_ref, axis=-1)
    loss_ref = jnp.mean(lse_ref - y_ref[jnp.arange(batch), targets])
    assert jnp.allclose(loss, loss_ref, rtol=1e-5, atol=1e-5), (loss, loss_ref)

    print("KERNEL_OK")
</pallas_src>

<mosaic_0001>
module attributes {stable_mosaic.version = 11 : i64} {
  func.func @_ce_kernel(%arg0: i32, %arg1: i32, %arg2: memref<8x32xf32, #tpu.memory_space<vmem>>, %arg3: memref<32x128xf32, #tpu.memory_space<vmem>>, %arg4: memref<1x128xf32, #tpu.memory_space<vmem>>, %arg5: memref<8x1xi32, #tpu.memory_space<vmem>>, %arg6: memref<8x1xf32, #tpu.memory_space<vmem>>, %arg7: memref<8x1xf32, #tpu.memory_space<vmem>>, %arg8: memref<8x1xf32, #tpu.memory_space<vmem>>, %arg9: memref<8x1xf32, #tpu.memory_space<vmem>>) attributes {dimension_semantics = [#tpu.dimension_semantics<parallel>, #tpu.dimension_semantics<arbitrary>], iteration_bounds = array<i64: 1, 1>, scalar_prefetch = 0 : i64, scratch_operands = 3 : i64, tpu.core_type = #tpu.core_type<tc>, window_params = [{transform_indices = @transform_0, window_bounds = array<i64: 8, 32>}, {transform_indices = @transform_1, window_bounds = array<i64: 32, 128>}, {transform_indices = @transform_2, window_bounds = array<i64: 1, 128>}, {transform_indices = @transform_3, window_bounds = array<i64: 8, 1>}, {transform_indices = @transform_4, window_bounds = array<i64: 8, 1>}]} {
    %c0_i32 = arith.constant 0 : i32
    %0 = arith.cmpi eq, %arg1, %c0_i32 : i32
    %1 = arith.extui %0 : i1 to i32
    %c0_i32_0 = arith.constant 0 : i32
    %2 = arith.cmpi ne, %1, %c0_i32_0 : i32
    scf.if %2 {
      %cst_26 = arith.constant -1.000000e+30 : f32
      %42 = vector.broadcast %cst_26 : f32 to vector<8x1xf32>
      %c0_27 = arith.constant 0 : index
      %c0_28 = arith.constant 0 : index
      %43 = vector.load %arg7[%c0_27, %c0_28] : memref<8x1xf32, #tpu.memory_space<vmem>>, vector<8x1xf32>
      tpu.vector_store %arg7[%c0_27, %c0_28], %42 {strides = array<i32>} : memref<8x1xf32, #tpu.memory_space<vmem>>, vector<8x1xf32>,
      %cst_29 = arith.constant 0.000000e+00 : f32
      %44 = vector.broadcast %cst_29 : f32 to vector<8x1xf32>
      %c0_30 = arith.constant 0 : index
      %c0_31 = arith.constant 0 : index
      %45 = vector.load %arg8[%c0_30, %c0_31] : memref<8x1xf32, #tpu.memory_space<vmem>>, vector<8x1xf32>
      tpu.vector_store %arg8[%c0_30, %c0_31], %44 {strides = array<i32>} : memref<8x1xf32, #tpu.memory_space<vmem>>, vector<8x1xf32>,
      %cst_32 = arith.constant 0.000000e+00 : f32
      %46 = vector.broadcast %cst_32 : f32 to vector<8x1xf32>
      %c0_33 = arith.constant 0 : index
      %c0_34 = arith.constant 0 : index
      %47 = vector.load %arg9[%c0_33, %c0_34] : memref<8x1xf32, #tpu.memory_space<vmem>>, vector<8x1xf32>
      tpu.vector_store %arg9[%c0_33, %c0_34], %46 {strides = array<i32>} : memref<8x1xf32, #tpu.memory_space<vmem>>, vector<8x1xf32>,
    } else {
    }
    %c0 = arith.constant 0 : index
    %c0_1 = arith.constant 0 : index
    %3 = vector.load %arg2[%c0, %c0_1] : memref<8x32xf32, #tpu.memory_space<vmem>>, vector<8x32xf32>
    %c0_2 = arith.constant 0 : index
    %c0_3 = arith.constant 0 : index
    %4 = vector.load %arg3[%c0_2, %c0_3] : memref<32x128xf32, #tpu.memory_space<vmem>>, vector<32x128xf32>
    %cst = arith.constant dense<0.000000e+00> : vector<8x128xf32>
    %5 = tpu.matmul %3, %4, %cst {dimension_numbers = #tpu.dot_dimension_numbers<[1], [0], [0], [1], [0, 0, 1, 1], [], []>} : vector<8x32xf32>, vector<32x128xf32>, vector<8x128xf32> -> vector<8x128xf32>
    %c0_4 = arith.constant 0 : index
    %c0_5 = arith.constant 0 : index
    %6 = vector.load %arg4[%c0_4, %c0_5] : memref<1x128xf32, #tpu.memory_space<vmem>>, vector<1x128xf32>
    %7 = vector.broadcast %6 : vector<1x128xf32> to vector<8x128xf32>
    %8 = arith.addf %5, %7 : vector<8x128xf32>
    %c128_i32 = arith.constant 128 : i32
    %9 = arith.muli %arg1, %c128_i32 : i32
    %10 = tpu.iota {dimensions = array<i32: 1>} : vector<8x128xi32>
    %11 = vector.broadcast %9 : i32 to vector<8x128xi32>
    %12 = arith.addi %11, %10 : vector<8x128xi32>
    %c0_6 = arith.constant 0 : index
    %c0_7 = arith.constant 0 : index
    %13 = vector.load %arg9[%c0_6, %c0_7] : memref<8x1xf32, #tpu.memory_space<vmem>>, vector<8x1xf32>
    %c0_8 = arith.constant 0 : index
    %c0_9 = arith.constant 0 : index
    %14 = vector.load %arg5[%c0_8, %c0_9] : memref<8x1xi32, #tpu.memory_space<vmem>>, vector<8x1xi32>
    %15 = vector.broadcast %14 : vector<8x1xi32> to vector<8x128xi32>
    %16 = arith.cmpi eq, %12, %15 : vector<8x128xi32>
    %cst_10 = arith.constant 0.000000e+00 : f32
    %17 = vector.broadcast %cst_10 : f32 to vector<8x128xf32>
    %18 = arith.select %16, %8, %17 : vector<8x128xi1>, vector<8x128xf32>
    %cst_11 = arith.constant dense<0.000000e+00> : vector<8xf32>
    %19 = vector.multi_reduction <add>, %18, %cst_11 [1] : vector<8x128xf32> to vector<8xf32>
    %20 = vector.shape_cast %19 : vector<8xf32> to vector<8x1xf32>
    %21 = arith.addf %13, %20 : vector<8x1xf32>
    %c0_12 = arith.constant 0 : index
    %c0_13 = arith.constant 0 : index
    %22 = vector.load %arg9[%c0_12, %c0_13] : memref<8x1xf32, #tpu.memory_space<vmem>>, vector<8x1xf32>
    tpu.vector_store %arg9[%c0_12, %c0_13], %21 {strides = array<i32>} : memref<8x1xf32, #tpu.memory_space<vmem>>, vector<8x1xf32>,
    %c0_14 = arith.constant 0 : index
    %c0_15 = arith.constant 0 : index
    %23 = vector.load %arg7[%c0_14, %c0_15] : memref<8x1xf32, #tpu.memory_space<vmem>>, vector<8x1xf32>
    %cst_16 = arith.constant dense<0xFF800000> : vector<8xf32>
    %24 = vector.multi_reduction <maximumf>, %8, %cst_16 [1] : vector<8x128xf32> to vector<8xf32>
    %25 = vector.shape_cast %24 : vector<8xf32> to vector<8x1xf32>
    %26 = arith.maximumf %23, %25 : vector<8x1xf32>
    %c0_17 = arith.constant 0 : index
    %c0_18 = arith.constant 0 : index
    %27 = vector.load %arg8[%c0_17, %c0_18] : memref<8x1xf32, #tpu.memory_space<vmem>>, vector<8x1xf32>
    %28 = arith.subf %23, %26 : vector<8x1xf32>
    %29 = math.exp %28 : vector<8x1xf32>
    %30 = arith.mulf %27, %29 : vector<8x1xf32>
    %31 = vector.broadcast %26 : vector<8x1xf32> to vector<8x128xf32>
    %32 = arith.subf %8, %31 : vector<8x128xf32>
    %33 = math.exp %32 : vector<8x128xf32>
    %cst_19 = arith.constant dense<0.000000e+00> : vector<8xf32>
    %34 = vector.multi_reduction <add>, %33, %cst_19 [1] : vector<8x128xf32> to vector<8xf32>
    %35 = vector.shape_cast %34 : vector<8xf32> to vector<8x1xf32>
    %36 = arith.addf %30, %35 : vector<8x1xf32>
    %c0_20 = arith.constant 0 : index
    %c0_21 = arith.constant 0 : index
    %37 = vector.load %arg8[%c0_20, %c0_21] : memref<8x1xf32, #tpu.memory_space<vmem>>, vector<8x1xf32>
    tpu.vector_store %arg8[%c0_20, %c0_21], %36 {strides = array<i32>} : memref<8x1xf32, #tpu.memory_space<vmem>>, vector<8x1xf32>,
    %c0_22 = arith.constant 0 : index
    %c0_23 = arith.constant 0 : index
    %38 = vector.load %arg7[%c0_22, %c0_23] : memref<8x1xf32, #tpu.memory_space<vmem>>, vector<8x1xf32>
    tpu.vector_store %arg7[%c0_22, %c0_23], %26 {strides = array<i32>} : memref<8x1xf32, #tpu.memory_space<vmem>>, vector<8x1xf32>,
    %c0_i32_24 = arith.constant 0 : i32
    %39 = arith.cmpi eq, %arg1, %c0_i32_24 : i32
    %40 = arith.extui %39 : i1 to i32
    %c0_i32_25 = arith.constant 0 : i32
    %41 = arith.cmpi ne, %40, %c0_i32_25 : i32
    scf.if %41 {
      %c0_26 = arith.constant 0 : index
      %c0_27 = arith.constant 0 : index
      %42 = vector.load %arg7[%c0_26, %c0_27] : memref<8x1xf32, #tpu.memory_space<vmem>>, vector<8x1xf32>
      %c0_28 = arith.constant 0 : index
      %c0_29 = arith.constant 0 : index
      %43 = vector.load %arg8[%c0_28, %c0_29] : memref<8x1xf32, #tpu.memory_space<vmem>>, vector<8x1xf32>
      %44 = math.log %43 : vector<8x1xf32>
      %45 = arith.addf %42, %44 : vector<8x1xf32>
      %c8_i32 = arith.constant 8 : i32
      %46 = arith.muli %arg0, %c8_i32 : i32
      %47 = tpu.iota {dimensions = array<i32: 0>} : vector<8x1xi32>
      %48 = vector.broadcast %46 : i32 to vector<8x1xi32>
      %49 = arith.addi %48, %47 : vector<8x1xi32>
      %c8_i32_30 = arith.constant 8 : i32
      %50 = vector.broadcast %c8_i32_30 : i32 to vector<8x1xi32>
      %51 = arith.cmpi slt, %49, %50 : vector<8x1xi32>
      %c0_31 = arith.constant 0 : index
      %c0_32 = arith.constant 0 : index
      %52 = vector.load %arg9[%c0_31, %c0_32] : memref<8x1xf32, #tpu.memory_space<vmem>>, vector<8x1xf32>
      %53 = arith.subf %45, %52 : vector<8x1xf32>
      %cst_33 = arith.constant 0.000000e+00 : f32
      %54 = vector.broadcast %cst_33 : f32 to vector<8x1xf32>
      %55 = arith.select %51, %53, %54 : vector<8x1xi1>, vector<8x1xf32>
      %c0_34 = arith.constant 0 : index
      %c0_35 = arith.constant 0 : index
      %56 = vector.load %arg6[%c0_34, %c0_35] : memref<8x1xf32, #tpu.memory_space<vmem>>, vector<8x1xf32>
      tpu.vector_store %arg6[%c0_34, %c0_35], %55 {strides = array<i32>} : memref<8x1xf32, #tpu.memory_space<vmem>>, vector<8x1xf32>,
    } else {
    }
    return
  }
  func.func @transform_0(%arg0: i32, %arg1: i32) -> (i32, i32) {
    %c0_i32 = arith.constant 0 : i32
    %c0_i32_0 = arith.constant 0 : i32
    return %arg0, %c0_i32 : i32, i32
  }
  func.func @transform_1(%arg0: i32, %arg1: i32) -> (i32, i32) {
    %c0_i32 = arith.constant 0 : i32
    %c0_i32_0 = arith.constant 0 : i32
    return %c0_i32, %arg1 : i32, i32
  }
  func.func @transform_2(%arg0: i32, %arg1: i32) -> (i32, i32) {
    %c0_i32 = arith.constant 0 : i32
    %c0_i32_0 = arith.constant 0 : i32
    return %c0_i32, %arg1 : i32, i32
  }
  func.func @transform_3(%arg0: i32, %arg1: i32) -> (i32, i32) {
    %c0_i32 = arith.constant 0 : i32
    %c0_i32_0 = arith.constant 0 : i32
    return %arg0, %c0_i32 : i32, i32
  }
  func.func @transform_4(%arg0: i32, %arg1: i32) -> (i32, i32) {
    %c0_i32 = arith.constant 0 : i32
    %c0_i32_0 = arith.constant 0 : i32
    return %arg0, %c0_i32 : i32, i32
  }
}

</mosaic_0001>

<bundles_post_ra>
// kernel: tpu_custom_call.1
= control target key start
LH: loop header
LB: loop body
LE: loop exit
PB: predicated region body
PF: predicated region fallthrough
CT: control target
= control target key end

     0   :  { %9 = vsyncpa [#allocation6], 0  ;;  %s251_s15 = smov [#allocation5]   ;;  %s315_s0 = inlined_call_operand.vmem [shape: f32[8,32], index: 0, kind: input, shape index: {}]   ;;  %s316_s1 = inlined_call_operand.hbm [shape: f32[32,128], index: 1, kind: input, shape index: {}]   ;;  %s317_s2 = inlined_call_operand.vmem [shape: f32[1,128], index: 2, kind: input, shape index: {}]   ;;  %s318_s3 = inlined_call_operand.vmem [shape: s32[8,1], index: 3, kind: input, shape index: {}]   ;;  %s319_s4 = inlined_call_operand.vmem [shape: f32[8,1], index: 4, kind: output, shape index: {}]  }
   0x1   :  { %s17_s16 = sshll.u32 %s251_s15, 4  ;;  %s227_s19 = scalar_lea.hbm %s316_s1, 512  ;;  %s18_s16 = int_to_ptr.vmem [resolvable:$true] %s17_s16 }
   0x2   :  { %p228_p0 = scmp.ne.s32.totalorder %s316_s1, %s227_s19  ;;  %p231_p1 = scmp.lt.u32.totalorder %s227_s19, %s316_s1 }
   0x4   :  { %p233_p2 = pnand %p231_p1, %p228_p0 }
   0x6   :  { %236 = shalt.err (!%p233_p2)
}
   0x7   :  { %s237_s24 = scalar_lea.vmem %s18_s16, 512  ;;  %p242_p4 = scmp.lt.s32.totalorder %s18_s16, %s18_s16 }
   0x8   :  { %p238_p3 = scmp.ne.s32.totalorder %s18_s16, %s237_s24  ;;  %p243_p5 = scmp.lt.s32.totalorder %s237_s24, %s237_s24 }
   0xa   :  { %p244_p6 = por %p243_p5, %p242_p4 }
   0xc   :  { %p245_p7 = pnand %p244_p6, %p238_p3 }
   0xe   :  { %248 = shalt.err (!%p245_p7)
}
   0xf   :  { %s252_s25 = smov 128   ;;  %s253_s26 = smov 8  }
  0x10   :  { %23 = dma.hbm_to_vmem [thread:$0]  %s316_s1, 512, %s18_s16, [#allocation6], %s252_s25, %s252_s25, %s253_s26  }
  0x11   :  { %249 = dma.done.wait [#allocation6], 512  }
  0x12   :  { %250 = vsyncadd [#allocation6], 4294966784  ;;  %vm35_vm0 = vcmask 7168   ;;  %v254_v0 = vmov 0.0|0.0   ;;  %v255_v1 = vmov 0.0   ;;  %vm256_vm1 = vmmov 0  }
  0x13   :  { %205 = vmatprep.subr.bf16.mxu0 %v254_v0  ;;  %37 = vst.msk [vmem:[#allocation3] sm:$0xff] %vm35_vm0, %v255_v1  ;;  %38 = vst.msk [vmem:[#allocation4] sm:$0xff] %vm35_vm0, %v255_v1  ;;  %202 = vmatprep.mubr.msk.f32.mxu0 %vm256_vm1, %v255_v1  ;;  %v257_v2 = vmov 0   ;;  %v40_v3 = vld [vmem:[#allocation5] sm:$0xff]  ;;  %v41_v4 = vld [vmem:[#allocation5 + $0x8] sm:$0xff]  ;;  %vm51_vm2 = vcmask 261120   ;;  %v126_v23 = vlaneseq }
  0x14   :  { %220 = vset.pattern.permute.xlu1 %v257_v2  ;;  %219 = vset.pattern.permute.xlu0 %v257_v2  ;;  %v42_v5 = vld [vmem:[#allocation5 + $0x10] sm:$0xff]  ;;  %v206_v6 = vpack.c.bf16 %v41_v4, %v40_v3  ;;  %v43_v7 = vld [vmem:[#allocation5 + $0x18] sm:$0xff]  ;;  %v131_v8 = vld [vmem:[%s318_s3] sm:$0xff]  ;;  %v258_v11 = vmov -1e+30  }
  0x15   :  { %133 = vperm.xlu1 %220, %v131_v8   ;;  %v209_v9 = vpack.c.bf16 %v43_v7, %v42_v5  ;;  %v39_v10 = vld [vmem:[%s315_s0] sm:$0xff]  ;;  %36 = vst.msk [vmem:[#allocation2] sm:$0xff] %vm35_vm0, %v258_v11  ;;  %v127_v24 = vand.u32 127, %v126_v23 }
  0x16   :  { %207 = vmatpush3.bf16.msra.mxu0 %v206_v6  ;;  %v187_v12 = vld [vmem:[%s317_s2] ss:$0 sm:$0xff] }
  0x17   :  { %208 = vmatprep.subr.bf16.mxu0 %v254_v0 }
  0x1a   :  { %210 = vmatpush3.bf16.msra.mxu0 %v209_v9  ;;  %v146_v30 = vld [vmem:[#allocation3] sm:$0xff]  ;;  %v130_v34 = vld [vmem:[#allocation4] sm:$0xff] }
  0x1c   :  { %v142_v16 = vld [vmem:[#allocation2] sm:$0xff] }
  0x1d   :  { %203 = vmatmul.mubr.msk.f32.vlgmr.msra.gmra.mrb[0].mxu0 %vm51_vm2, %v39_v10 }
  0x94   :  { %v134_v25 = vpop.permute.xlu1 %133 }
  0x95   :  { %vm135_vm3 = vcmp.eq.s32.totalorder %v127_v24, %v134_v25 }
  0xf0   :  { %v121_v13 = vpop.f32.mrb[0].mxu0 }
  0xf1   :  { %v122_v14 = vadd.f32 %v187_v12, %v121_v13  ;;  %v204_v15 = vpop.f32.mrb[1].mxu0 }
  0xf3   :  { %143 = vmax.xlane.f32.xlu0 %v122_v14  ;;  %v136_v27 = vsel %vm135_vm3, %v122_v14, 0.0 }
 0x180   :  { %v144_v17 = vpop.xlane.xlu0 %143 }
 0x181   :  { %v145_v18 = vmax.f32 %v142_v16, %v144_v17 }
 0x183   :  { %v147_v19 = vsub.f32 %v142_v16, %v145_v18  ;;  %163 = vst.msk [vmem:[#allocation2] sm:$0xff] %vm35_vm0, %v145_v18  ;;  %153 = vperm.xlu0 %219, %v145_v18  }
 0x185   :  { %v148_v28 = vmul.f32 1.442695, %v147_v19 }
 0x18a   :  { %v167_v40 = vld [vmem:[#allocation2] sm:$0xff] }
 0x202   :  { %v154_v20 = vpop.permute.xlu0 %153 }
 0x203   :  { %v156_v21 = vsub.f32 %v122_v14, %v154_v20 }
 0x205   :  { %v157_v22 = vmul.f32 1.442695, %v156_v21 }
 0x207   :  { %221 = vpow2.f32 %v157_v22 }
 0x208   :  { %223 = vpow2.f32 %v148_v28 }
 0x211   :  { %v222_v26 = vpop.eup %221 }
 0x212   :  { %159 = vadd.xlane.f32.xlu1 %v222_v26  ;;  %v224_v29 = vpop.eup %223 }
 0x213   :  { %v150_v31 = vmul.f32 %v224_v29, %v146_v30 }
 0x216   :  { %137 = vadd.xlane.f32.xlu1 %v136_v27 }
 0x29f   :  { %v160_v32 = vpop.xlane.xlu1 %159 }
 0x2a0   :  { %v161_v33 = vadd.f32 %v160_v32, %v150_v31 }
 0x2a2   :  { %162 = vst.msk [vmem:[#allocation3] sm:$0xff] %vm35_vm0, %v161_v33 }
 0x2a3   :  { %v138_v35 = vpop.xlane.xlu1 %137 }
 0x2a4   :  { %v139_v36 = vadd.f32 %v138_v35, %v130_v34 }
 0x2a6   :  { %141 = vst.msk [vmem:[#allocation4] sm:$0xff] %vm35_vm0, %v139_v36 }
 0x2a9   :  { %v168_v37 = vld [vmem:[#allocation3] sm:$0xff] }
 0x2aa   :  { %225 = vlog2.f32 %v168_v37 }
 0x2ad   :  { %v178_v42 = vld [vmem:[#allocation4] sm:$0xff] }
 0x2b4   :  { %v226_v38 = vpop.eup %225 }
 0x2b5   :  { %v170_v39 = vmul.f32 0.6931472, %v226_v38 }
 0x2b7   :  { %v171_v41 = vadd.f32 %v170_v39, %v167_v40 }
 0x2b9   :  { %v179_v43 = vsub.f32 %v171_v41, %v178_v42 }
 0x2bb   :  { %181 = vst.msk [vmem:[%s319_s4] sm:$0xff] %vm35_vm0, %v179_v43 }
 0x2bc   :  { %186 = vsyncpa [#allocation6], 1 }

</bundles_post_ra>
